<compile_context>
chip_gen: v5e
topology: v5e:2x2
jax: 0.10.0
libtpu: 0.0.40
codegen_flags: <defaults>
</compile_context>

<pallas_src>
import functools

import jax
import jax.numpy as jnp
from jax.experimental import pallas as pl
from jax.experimental.pallas import tpu as pltpu

HIDDEN = 512  # fixed by the module definition


def _round_up(x, m):
    return ((x + m - 1) // m) * m


def _cdiv(a, b):
    return (a + b - 1) // b


def _disc_kernel(x_ref, w1_ref, b1_ref, w2_ref, b2_ref, o_ref, *scratch,
                 n_k, rem_k, tile_k, compute_dtype):
    # x_ref : (TB, TK)        w1_ref: (TK, 512)
    # b1_ref: (1, 512) f32    w2_ref: (1, 512) f32
    # b2_ref: (1, 1)  f32 SMEM   o_ref: (TB, 1) f32
    # scratch: () on the single-K path, or ((TB, 512) f32 VMEM,) when K-tiled.
    acc_ref = scratch[0] if scratch else None

    x = x_ref[...].astype(compute_dtype)
    w1 = w1_ref[...].astype(compute_dtype)

    if rem_k:
        # Last K block is a partial block: its out-of-range x columns / W1 rows
        # hold undefined data (possibly NaN/Inf) -> mask both to exact zeros.
        k = pl.program_id(1)
        valid = jnp.where(k == n_k - 1, rem_k, tile_k)
        col = jax.lax.broadcasted_iota(jnp.int32, x.shape, 1)
        x = jnp.where(col < valid, x, jnp.zeros_like(x))
        row = jax.lax.broadcasted_iota(jnp.int32, w1.shape, 0)
        w1 = jnp.where(row < valid, w1, jnp.zeros_like(w1))

    # Linear 1 partial product on the MXU, f32 accumulation.
    part = jnp.dot(x, w1, preferred_element_type=jnp.float32)

    def epilogue(h_pre):
        # bias + ReLU
        h = jnp.maximum(h_pre + b1_ref[...], 0.0)                    # (TB, 512)
        # Linear 2 (512 -> 1): N=1 matmul starves the MXU, so use the
        # VPU (elementwise mul) + XLU (lane reduction) instead.
        z = jnp.sum(h * w2_ref[...], axis=-1, keepdims=True) + b2_ref[0, 0]
        # Sigmoid: exp on the EUP + approximate reciprocal (also EUP slot).
        o_ref[...] = pl.reciprocal(1.0 + jnp.exp(-z), approx=True).astype(o_ref.dtype)

    if n_k == 1:
        # Common path (W1 resident): no VMEM accumulator round-trip at all.
        epilogue(part)
    else:
        k = pl.program_id(1)

        @pl.when(k == 0)
        def _():
            acc_ref[...] = part                      # no zero-init + RMW

        @pl.when((k > 0) & (k < n_k - 1))
        def _():
            acc_ref[...] += part

        @pl.when(k == n_k - 1)
        def _():
            epilogue(acc_ref[...] + part)            # fold last partial in vregs


@functools.partial(jax.jit, static_argnames=("batch_tile", "k_tile",
                                              "resident_k_max", "compute_dtype"))
def discriminator_forward(x, w1, b1, w2, b2, *, batch_tile=512, k_tile=2048,
                          resident_k_max=6144, compute_dtype=jnp.bfloat16):
    """x: (B, D). w1: (D, 512), b1: (512,), w2: (512,1)/(1,512)/(512,), b2: (1,).

    Returns (B, 1) float32 in [0, 1]."""
    B, D = x.shape
    assert w1.shape == (D, HIDDEN)

    b1_2d = b1.reshape(1, HIDDEN).astype(jnp.float32)
    w2_row = w2.reshape(1, HIDDEN).astype(jnp.float32)
    b2_2d = b2.reshape(1, 1).astype(jnp.float32)

    # ---- batch tiling (even split, no padding; Pallas drops OOB output rows) -
    n_b = max(1, _cdiv(B, batch_tile))
    if B >= 256:
        n_b = max(n_b, 2)            # v7x: keep both TensorCores busy
    tile_b = min(_round_up(_cdiv(B, n_b), 16), _round_up(B, 8))
    n_b = _cdiv(B, tile_b)

    # ---- reduction (input_dim) tiling --------------------------------------
    # Keep W1 resident (single K step) for moderate D; K-tile with a big tile
    # only for very large input_dim.  No padding of x or W1: the K remainder
    # is masked inside the kernel.
    if D <= resident_k_max:
        tile_k, n_k, rem_k = D, 1, 0
    else:
        tile_k = k_tile
        n_k = _cdiv(D, tile_k)
        rem_k = D % tile_k

    grid = (n_b, n_k)

    x_elt = jnp.dtype(x.dtype).itemsize
    w1_elt = jnp.dtype(w1.dtype).itemsize
    w1_passes = 1 if n_k == 1 else n_b      # W1 re-streamed once per batch tile
    cost = pl.CostEstimate(
        flops=2 * B * D * HIDDEN + 4 * B * HIDDEN,
        transcendentals=B,
        bytes_accessed=(B * D * x_elt + w1_passes * D * HIDDEN * w1_elt
                        + (2 * HIDDEN + 1) * 4 + B * 4),
    )

    kernel = functools.partial(_disc_kernel, n_k=n_k, rem_k=rem_k,
                               tile_k=tile_k, compute_dtype=compute_dtype)
    scratch_shapes = [] if n_k == 1 else [pltpu.VMEM((tile_b, HIDDEN), jnp.float32)]

    out = pl.pallas_call(
        kernel,
        out_shape=jax.ShapeDtypeStruct((B, 1), jnp.float32),
        grid_spec=pltpu.PrefetchScalarGridSpec(
            num_scalar_prefetch=0,
            grid=grid,
            in_specs=[
                pl.BlockSpec((tile_b, tile_k), lambda i, k: (i, k)),   # x tile
                pl.BlockSpec((tile_k, HIDDEN), lambda i, k: (k, 0)),   # W1 tile
                pl.BlockSpec((1, HIDDEN), lambda i, k: (0, 0)),        # b1 (resident)
                pl.BlockSpec((1, HIDDEN), lambda i, k: (0, 0)),        # w2 row (resident)
                pl.BlockSpec(memory_space=pltpu.MemorySpace.SMEM),     # b2 scalar
            ],
            out_specs=pl.BlockSpec((tile_b, 1), lambda i, k: (i, 0)),
            scratch_shapes=scratch_shapes,
        ),
        compiler_params=pltpu.CompilerParams(
            dimension_semantics=("parallel", "arbitrary"),
            vmem_limit_bytes=48 * 1024 * 1024,
        ),
        cost_estimate=cost,
    )(x, w1, b1_2d, w2_row, b2_2d)

    return out


def init_params(key, input_dim):
    """Deterministic init mimicking PyTorch Linear default (uniform +-1/sqrt(fan_in))."""
    k1, k2, k3, k4 = jax.random.split(key, 4)
    lim1 = 1.0 / jnp.sqrt(jnp.float32(input_dim))
    lim2 = 1.0 / jnp.sqrt(jnp.float32(HIDDEN))
    w1 = jax.random.uniform(k1, (input_dim, HIDDEN), jnp.float32, -lim1, lim1)
    b1 = jax.random.uniform(k2, (HIDDEN,), jnp.float32, -lim1, lim1)
    w2 = jax.random.uniform(k3, (HIDDEN, 1), jnp.float32, -lim2, lim2)
    b2 = jax.random.uniform(k4, (1,), jnp.float32, -lim2, lim2)
    return w1, b1, w2, b2


def _reference(x_, w1_, b1_, w2_, b2_):
    h = jnp.maximum(x_.astype(jnp.float32) @ w1_.astype(jnp.float32) + b1_, 0.0)
    return jax.nn.sigmoid(h @ w2_.reshape(HIDDEN, 1) + b2_)


if __name__ == "__main__":
    key = jax.random.PRNGKey(0)
    kx, kp = jax.random.split(key)

    # Small case matching the module's expected usage.
    batch, input_dim = 8, 32
    x = jax.random.normal(kx, (batch, input_dim), jnp.float32).astype(jnp.bfloat16)
    w1, b1, w2, b2 = init_params(kp, input_dim)
    w1_bf = w1.astype(jnp.bfloat16)

    out = jax.block_until_ready(discriminator_forward(x, w1_bf, b1, w2, b2))
    ref = _reference(x, w1_bf, b1, w2, b2)
    assert out.shape == (batch, 1)
    assert jnp.allclose(out, ref, atol=1e-2, rtol=1e-2), "mismatch vs reference"

    # Ragged batch, resident-W1 path: 2 batch tiles of 160 rows (last partial).
    batch2, dim2 = 300, 2560
    k2x, k2p = jax.random.split(jax.random.PRNGKey(1))
    x2 = jax.random.normal(k2x, (batch2, dim2), jnp.float32).astype(jnp.bfloat16)
    w1b, b1b, w2b, b2b = init_params(k2p, dim2)
    w1b_bf = w1b.astype(jnp.bfloat16)
    out2 = jax.block_until_ready(discriminator_forward(x2, w1b_bf, b1b, w2b, b2b))
    ref2 = _reference(x2, w1b_bf, b1b, w2b, b2b)
    assert out2.shape == (batch2, 1)
    assert jnp.allclose(out2, ref2, atol=2e-2, rtol=2e-2), "mismatch (resident path)"

    # K-tiled path with a remainder (forces the in-kernel K mask + accumulator).
    out3 = jax.block_until_ready(
        discriminator_forward(x2, w1b_bf, b1b, w2b, b2b,
                              resident_k_max=1024, k_tile=1024))
    assert out3.shape == (batch2, 1)
    assert jnp.allclose(out3, ref2, atol=2e-2, rtol=2e-2), "mismatch (K-tiled path)"

    print("KERNEL_OK")
</pallas_src>

<mosaic_0001>
module attributes {stable_mosaic.version = 11 : i64} {
  func.func @_disc_kernel(%arg0: i32, %arg1: i32, %arg2: memref<8x32xbf16, #tpu.memory_space<vmem>>, %arg3: memref<32x512xbf16, #tpu.memory_space<vmem>>, %arg4: memref<1x512xf32, #tpu.memory_space<vmem>>, %arg5: memref<1x512xf32, #tpu.memory_space<vmem>>, %arg6: memref<1x1xf32, #tpu.memory_space<smem>>, %arg7: memref<8x1xf32, #tpu.memory_space<vmem>>) attributes {dimension_semantics = [#tpu.dimension_semantics<parallel>, #tpu.dimension_semantics<arbitrary>], iteration_bounds = array<i64: 1, 1>, scalar_prefetch = 0 : i64, scratch_operands = 0 : i64, tpu.core_type = #tpu.core_type<tc>, window_params = [{transform_indices = @transform_0, window_bounds = array<i64: 8, 32>}, {transform_indices = @transform_1, window_bounds = array<i64: 32, 512>}, {pipeline_mode = #tpu.pipeline_mode<synchronous>, transform_indices = @transform_2, window_bounds = array<i64: 1, 512>}, {pipeline_mode = #tpu.pipeline_mode<synchronous>, transform_indices = @transform_3, window_bounds = array<i64: 1, 512>}, {transform_indices = @transform_4, window_bounds = array<i64: 1, 1>}, {transform_indices = @transform_5, window_bounds = array<i64: 8, 1>}]} {
    %c0 = arith.constant 0 : index
    %c0_0 = arith.constant 0 : index
    %0 = vector.load %arg2[%c0, %c0_0] : memref<8x32xbf16, #tpu.memory_space<vmem>>, vector<8x32xbf16>
    %c0_1 = arith.constant 0 : index
    %c0_2 = arith.constant 0 : index
    %1 = vector.load %arg3[%c0_1, %c0_2] : memref<32x512xbf16, #tpu.memory_space<vmem>>, vector<32x512xbf16>
    %cst = arith.constant dense<0.000000e+00> : vector<8x512xf32>
    %2 = tpu.matmul %0, %1, %cst {dimension_numbers = #tpu.dot_dimension_numbers<[1], [0], [0], [1], [0, 0, 1, 1], [], []>} : vector<8x32xbf16>, vector<32x512xbf16>, vector<8x512xf32> -> vector<8x512xf32>
    %c0_3 = arith.constant 0 : index
    %c0_4 = arith.constant 0 : index
    %3 = vector.load %arg4[%c0_3, %c0_4] : memref<1x512xf32, #tpu.memory_space<vmem>>, vector<1x512xf32>
    %4 = vector.broadcast %3 : vector<1x512xf32> to vector<8x512xf32>
    %5 = arith.addf %2, %4 : vector<8x512xf32>
    %cst_5 = arith.constant 0.000000e+00 : f32
    %6 = vector.broadcast %cst_5 : f32 to vector<8x512xf32>
    %7 = arith.maximumf %5, %6 : vector<8x512xf32>
    %c0_6 = arith.constant 0 : index
    %c0_7 = arith.constant 0 : index
    %8 = vector.load %arg5[%c0_6, %c0_7] : memref<1x512xf32, #tpu.memory_space<vmem>>, vector<1x512xf32>
    %9 = vector.broadcast %8 : vector<1x512xf32> to vector<8x512xf32>
    %10 = arith.mulf %7, %9 : vector<8x512xf32>
    %cst_8 = arith.constant dense<0.000000e+00> : vector<8xf32>
    %11 = vector.multi_reduction <add>, %10, %cst_8 [1] : vector<8x512xf32> to vector<8xf32>
    %12 = vector.shape_cast %11 : vector<8xf32> to vector<8x1xf32>
    %c0_9 = arith.constant 0 : index
    %c0_10 = arith.constant 0 : index
    %13 = memref.load %arg6[%c0_9, %c0_10] : memref<1x1xf32, #tpu.memory_space<smem>>
    %14 = vector.broadcast %13 : f32 to vector<8x1xf32>
    %15 = arith.addf %12, %14 : vector<8x1xf32>
    %cst_11 = arith.constant 0.000000e+00 : f32
    %16 = vector.broadcast %cst_11 : f32 to vector<8x1xf32>
    %17 = arith.subf %16, %15 : vector<8x1xf32>
    %18 = math.exp %17 : vector<8x1xf32>
    %cst_12 = arith.constant 1.000000e+00 : f32
    %19 = vector.broadcast %cst_12 : f32 to vector<8x1xf32>
    %20 = arith.addf %19, %18 : vector<8x1xf32>
    %21 = tpu.reciprocal %20 {approx = true} : vector<8x1xf32> -> vector<8x1xf32>
    %c0_13 = arith.constant 0 : index
    %c0_14 = arith.constant 0 : index
    %22 = vector.load %arg7[%c0_13, %c0_14] : memref<8x1xf32, #tpu.memory_space<vmem>>, vector<8x1xf32>
    tpu.vector_store %arg7[%c0_13, %c0_14], %21 {strides = array<i32>} : memref<8x1xf32, #tpu.memory_space<vmem>>, vector<8x1xf32>,
    return
  }
  func.func @transform_0(%arg0: i32, %arg1: i32) -> (i32, i32) {
    %c0_i32 = arith.constant 0 : i32
    return %arg0, %arg1 : i32, i32
  }
  func.func @transform_1(%arg0: i32, %arg1: i32) -> (i32, i32) {
    %c0_i32 = arith.constant 0 : i32
    %c0_i32_0 = arith.constant 0 : i32
    return %arg1, %c0_i32 : i32, i32
  }
  func.func @transform_2(%arg0: i32, %arg1: i32) -> (i32, i32) {
    %c0_i32 = arith.constant 0 : i32
    %c0_i32_0 = arith.constant 0 : i32
    %c0_i32_1 = arith.constant 0 : i32
    return %c0_i32, %c0_i32_0 : i32, i32
  }
  func.func @transform_3(%arg0: i32, %arg1: i32) -> (i32, i32) {
    %c0_i32 = arith.constant 0 : i32
    %c0_i32_0 = arith.constant 0 : i32
    %c0_i32_1 = arith.constant 0 : i32
    return %c0_i32, %c0_i32_0 : i32, i32
  }
  func.func @transform_4(%arg0: i32, %arg1: i32) -> (i32, i32) {
    %c0_i32 = arith.constant 0 : i32
    %c0_i32_0 = arith.constant 0 : i32
    %c0_i32_1 = arith.constant 0 : i32
    return %c0_i32, %c0_i32_0 : i32, i32
  }
  func.func @transform_5(%arg0: i32, %arg1: i32) -> (i32, i32) {
    %c0_i32 = arith.constant 0 : i32
    %c0_i32_0 = arith.constant 0 : i32
    return %arg0, %c0_i32 : i32, i32
  }
}

</mosaic_0001>

<bundles_post_ra>
// kernel: discriminator_forward.1
= control target key start
LH: loop header
LB: loop body
LE: loop exit
PB: predicated region body
PF: predicated region fallthrough
CT: control target
= control target key end

     0   :  { %11 = vsyncpa [#allocation4], 0  ;;  %s401_s0 = inlined_call_operand.vmem [shape: bf16[8,32], index: 0, kind: input, shape index: {}]   ;;  %s402_s1 = inlined_call_operand.hbm [shape: bf16[32,512], index: 1, kind: input, shape index: {}]   ;;  %s403_s2 = inlined_call_operand.hbm [shape: f32[1,512], index: 2, kind: input, shape index: {}]   ;;  %s404_s3 = inlined_call_operand.hbm [shape: f32[1,512], index: 3, kind: input, shape index: {}]   ;;  %s405_s4 = inlined_call_operand.<no memory space> [shape: f32[1,1], index: 4, kind: input, shape index: {}]   ;;  %s406_s5 = inlined_call_operand.vmem [shape: f32[8,1], index: 5, kind: output, shape index: {}]  }
   0x1   :  { %12 = vsyncpa [#allocation6], 0  ;;  %s33_s20 = sshll.u32 %s403_s2, 4  ;;  %s348_s21 = smov [#allocation5]   ;;  %s34_s20 = int_to_ptr.hbm [resolvable:$true] %s33_s20 }
   0x2   :  { %s35_s22 = sshll.u32 %s348_s21, 4  ;;  %s19_s25 = sshll.u32 %s402_s1, 4  ;;  %s36_s22 = int_to_ptr.vmem [resolvable:$true] %s35_s22  ;;  %s20_s25 = int_to_ptr.hbm [resolvable:$true] %s19_s25 }
   0x3   :  { %38 = dma.hbm_to_vmem [thread:$0]  %s34_s20, 64, %s36_s22, [#allocation6]  }
   0x4   :  { %s349_s26 = smov [#allocation3]   ;;  %s350_s28 = smov 256  }
   0x5   :  { %s21_s27 = sshll.u32 %s349_s26, 4  ;;  %s351_s29 = smov 16   ;;  %s22_s27 = int_to_ptr.vmem [resolvable:$true] %s21_s27 }
   0x6   :  { %27 = dma.hbm_to_vmem [thread:$0]  %s20_s25, 1024, %s22_s27, [#allocation4], %s350_s28, %s350_s28, %s351_s29  }
   0x7   :  { %s44_s2 = sshll.u32 %s404_s3, 4  ;;  %s352_s7 = smov [#allocation7]   ;;  %s45_s2 = int_to_ptr.hbm [resolvable:$true] %s44_s2 }
   0x8   :  { %s46_s8 = sshll.u32 %s352_s7, 4  ;;  %s47_s8 = int_to_ptr.vmem [resolvable:$true] %s46_s8 }
   0x9   :  { %49 = dma.hbm_to_vmem [thread:$0]  %s45_s2, 64, %s47_s8, [#allocation6]  }
   0xa   :  { %344 = dma.done.wait [#allocation4], 1024  }
   0xb   :  { %345 = vsyncadd [#allocation4], 4294966272 }
   0xc   :  { %346 = dma.done.wait [#allocation6], 128  }
   0xd   :  { %347 = vsyncadd [#allocation6], 4294967168  ;;  %v237_v0 = vld [vmem:[#allocation3 + $0x20] sm:$0xf]  ;;  %v261_v1 = vld [vmem:[#allocation3 + $0x2c] sm:$0xf0]  ;;  %v204_v58 = vstv %s405_s4 }
   0xe   :  { %v259_v2 = vld [vmem:[#allocation3 + $0x24] sm:$0xf]  ;;  %v238_v3 = vor.u32 %v261_v1, %v237_v0  ;;  %v239_v4 = vld [vmem:[#allocation3 + $0x30] sm:$0xf0]  ;;  %v245_v5 = vld [vmem:[#allocation3 + $0x28] sm:$0xf] }
   0xf   :  { %v262_v6 = vld [vmem:[#allocation3 + $0x34] sm:$0xf0]  ;;  %v242_v7 = vor.u32 %v259_v2, %v239_v4  ;;  %v260_v9 = vld [vmem:[#allocation3 + $0x2c] sm:$0xf]  ;;  %v247_v10 = vld [vmem:[#allocation3 + $0x38] sm:$0xf0] }
  0x10   :  { %v246_v8 = vor.u32 %v262_v6, %v245_v5  ;;  %v221_v11 = vld [vmem:[#allocation3] sm:$0xf]  ;;  %134 = vmatpush.bf16.msra.mxu0 %v238_v3  ;;  %v250_v12 = vor.u32 %v260_v9, %v247_v10  ;;  %v257_v13 = vld [vmem:[#allocation3 + $0xc] sm:$0xf0]  ;;  %v255_v14 = vld [vmem:[#allocation3 + $0x4] sm:$0xf] }
  0x11   :  { %v223_v15 = vld [vmem:[#allocation3 + $0x10] sm:$0xf0]  ;;  %147 = vmatpush.bf16.msra.mxu1 %v242_v7  ;;  %v222_v16 = vor.u32 %v257_v13, %v221_v11  ;;  %v229_v18 = vld [vmem:[#allocation3 + $0x8] sm:$0xf]  ;;  %v258_v19 = vld [vmem:[#allocation3 + $0x14] sm:$0xf0] }
  0x12   :  { %160 = vmatpush.bf16.msra.mxu2 %v246_v8  ;;  %v226_v17 = vor.u32 %v255_v14, %v223_v15  ;;  %v256_v20 = vld [vmem:[#allocation3 + $0xc] sm:$0xf]  ;;  %173 = vmatpush.bf16.msra.mxu3 %v250_v12  ;;  %v230_v21 = vor.u32 %v258_v19, %v229_v18  ;;  %v231_v22 = vld [vmem:[#allocation3 + $0x18] sm:$0xf0]  ;;  %v65_v24 = vld [vmem:[%s401_s0] sm:$0xf] }
  0x13   :  { %v234_v23 = vor.u32 %v256_v20, %v231_v22  ;;  %vm124_vm0 = vcmask 261120   ;;  %v74_v25 = vld [vmem:[#allocation5] sm:$0xf]  ;;  %v184_v28 = vld [vmem:[#allocation7] sm:$0xf]  ;;  %vm211_vm1 = vcmask 7168  }
  0x14   :  { %135 = vmatpush.bf16.msra.mxu0 %v222_v16  ;;  %v76_v26 = vperm.slane %v74_v25, 0  ;;  %v77_v27 = vperm.slane %v74_v25, 1  ;;  %v186_v32 = vperm.slane %v184_v28, 0  ;;  %v187_v34 = vperm.slane %v184_v28, 1 }
  0x15   :  { %148 = vmatpush.bf16.msra.mxu1 %v226_v17  ;;  %v78_v37 = vperm.slane %v74_v25, 2  ;;  %v79_v38 = vperm.slane %v74_v25, 3  ;;  %v188_v43 = vperm.slane %v184_v28, 2  ;;  %v189_v48 = vperm.slane %v184_v28, 3 }
  0x16   :  { %161 = vmatpush.bf16.msra.mxu2 %v230_v21  ;;  %174 = vmatpush.bf16.msra.mxu3 %v234_v23 }
  0x17   :  { %251 = vmatmul.msk.bf16.vlgmr.msra.gmra.mxu0 %vm124_vm0, %v65_v24 }
  0x18   :  { %252 = vmatmul.msk.bf16.vlgmr.msra.gmra.mxu1 %vm124_vm0, %v65_v24 }
  0x19   :  { %253 = vmatmul.msk.bf16.vlgmr.msra.gmra.mxu2 %vm124_vm0, %v65_v24  ;;  %254 = vmatmul.msk.bf16.vlgmr.msra.gmra.mxu3 %vm124_vm0, %v65_v24 }
  0x94   :  { %v137_v29 = vpop.f32.mrf.mxu0 }
  0x95   :  { %v138_v30 = vadd.f32 %v137_v29, %v76_v26  ;;  %v150_v31 = vpop.f32.mrf.mxu1 }
  0x96   :  { %v151_v33 = vadd.f32 %v150_v31, %v77_v27 }
  0x97   :  { %v180_v35 = vmax.f32 %v138_v30, 0.0 }
  0x98   :  { %v181_v36 = vmax.f32 %v151_v33, 0.0 }
  0x99   :  { %v194_v39 = vmul.f32 %v186_v32, %v180_v35 }
  0x9a   :  { %v195_v40 = vmul.f32 %v187_v34, %v181_v36 }
  0x9c   :  { %v163_v41 = vpop.f32.mrf.mxu2  ;;  %v176_v44 = vpop.f32.mrf.mxu3  ;;  %v198_v50 = vadd.f32 %v195_v40, %v194_v39 }
  0x9d   :  { %v164_v42 = vadd.f32 %v163_v41, %v78_v37  ;;  %v139_v45 = vpop.f32.mrf.mxu0  ;;  %v177_v46 = vadd.f32 %v176_v44, %v79_v38  ;;  %v152_v47 = vpop.f32.mrf.mxu1 }
  0x9f   :  { %v182_v49 = vmax.f32 %v164_v42, 0.0  ;;  %v183_v51 = vmax.f32 %v177_v46, 0.0 }
  0xa1   :  { %v196_v52 = vmul.f32 %v188_v43, %v182_v49  ;;  %v197_v53 = vmul.f32 %v189_v48, %v183_v51 }
  0xa3   :  { %v199_v54 = vadd.f32 %v198_v50, %v196_v52 }
  0xa4   :  { %v165_v55 = vpop.f32.mrf.mxu2  ;;  %v178_v56 = vpop.f32.mrf.mxu3 }
  0xa5   :  { %v200_v57 = vadd.f32 %v199_v54, %v197_v53 }
  0xa7   :  { %201 = vadd.xlane.f32.xlu0 %v200_v57 }
 0x11a   :  { %v202_v59 = vpop.xlane.xlu0 %201 }
 0x11b   :  { %v205_v60 = vadd.f32 %v204_v58, %v202_v59 }
 0x11d   :  { %v206_v61 = vsub.f32 0.0, %v205_v60 }
 0x11f   :  { %v207_v62 = vmul.f32 1.442695, %v206_v61 }
 0x121   :  { %268 = vpow2.f32 %v207_v62 }
 0x127   :  { %v269_v63 = vpop.eup %268 }
 0x128   :  { %v209_v0 = vadd.f32 1.0, %v269_v63 }
 0x12a   :  { %270 = vrcp.f32 %v209_v0 }
 0x130   :  { %v271_v1 = vpop.eup %270 }
 0x131   :  { %212 = vst.msk [vmem:[%s406_s5] sm:$0xff] %vm211_vm1, %v271_v1 }
 0x132   :  { %217 = vsyncpa [#allocation4], 1 }
 0x133   :  { %218 = vsyncpa [#allocation6], 1 }

</bundles_post_ra>
